<compile_context>
chip_gen: v7x
topology: tpu7x:2x2x1
jax: 0.10.0
libtpu: 0.0.40
codegen_flags: <defaults>
</compile_context>

<pallas_src>
import jax
import jax.numpy as jnp
from jax.experimental import pallas as pl
from jax.experimental.pallas import tpu as pltpu


def _jump_relu_kernel(thr_ref, x_ref, o_ref):
    """out = x * (x > threshold); threshold is a (1,) f32 scalar in SMEM."""
    x = x_ref[...]
    t = thr_ref[0]  # f32
    # Compare in f32 (exact Python-float threshold), multiply-by-mask matches
    # torch's `x * (x > threshold)` incl. NaN propagation. VPU is idle vs DMA.
    mask = (x.astype(jnp.float32) > t).astype(x.dtype)
    o_ref[...] = x * mask


def _cdiv(a: int, b: int) -> int:
    return -(-a // b)


def _sublane_multiple(dtype) -> int:
    """Minimum sublane tile for the packed dtype (8 f32 / 16 bf16 / 32 int8)."""
    return {4: 8, 2: 16, 1: 32}.get(jnp.dtype(dtype).itemsize, 8)


def _lane_dense_view(batch: int, d_sae: int, sub: int):
    """Pick a (rows, cols) reshape of the flat data with cols % 128 == 0.

    Prefers rows that are a multiple of the sublane tile (full (8,128) vreg
    tiles), then rows >= sublane tile, then the widest (most contiguous) cols.
    Returns the original shape when no lane-dense factoring exists.
    """
    if d_sae % 128 == 0:
        return batch, d_sae
    total = batch * d_sae
    if total % 128 != 0:
        return batch, d_sae  # cannot be made lane-dense; masked-store fallback
    base = total // 128
    best_key, best_shape = None, (batch, d_sae)
    d = 1
    while d * d <= base:
        if base % d == 0:
            for m in (d, base // d):
                rows, cols = base // m, 128 * m
                key = (rows % sub == 0, rows >= sub, cols)
                if best_key is None or key > best_key:
                    best_key, best_shape = key, (rows, cols)
        d += 1
    return best_shape


def jump_relu_forward(x: jax.Array,
                      threshold=0.0,
                      bandwidth: float = 1.0,
                      *,
                      target_block_bytes: int = 8 << 20) -> jax.Array:
    """JumpReLUModule.forward: x * (x > threshold), elementwise on (batch, d_sae)."""
    del bandwidth  # forward pass does not use bandwidth
    assert x.ndim == 2, "expected (batch, d_sae)"
    orig_shape = x.shape
    itemsize = jnp.dtype(x.dtype).itemsize
    sub = _sublane_multiple(x.dtype)

    # Lane-dense view for awkward widths (free reshape; op is elementwise).
    rows, cols = _lane_dense_view(orig_shape[0], orig_shape[1], sub)
    x2 = x.reshape(rows, cols) if (rows, cols) != orig_shape else x

    # Generation-aware VMEM budget (v7x: 64 MiB physical; v5e/v6e: 128 MiB).
    try:
        vmem_cap = int(pltpu.get_tpu_info().vmem_capacity_bytes)
    except Exception:
        vmem_cap = 64 << 20  # conservative default works on all generations
    vmem_budget = (3 * vmem_cap) // 4
    # in + out, each double-buffered (4x tile) plus slack => ~6x tile must fit.
    tile_budget = max(sub * 128 * itemsize,
                      min(int(target_block_bytes), vmem_budget // 6))

    # ---- lane (last-dim) tiling: full contiguous rows unless a single sublane
    #      stripe already exceeds the tile budget -------------------------------
    if cols % 128 == 0 and sub * cols * itemsize > tile_budget:
        block_cols = max(128, ((tile_budget // (sub * itemsize)) // 128) * 128)
        block_cols = min(block_cols, cols)
    else:
        block_cols = cols  # full last dim is always a legal block shape

    # ---- sublane (row) tiling: fill the tile budget ---------------------------
    rows_target = max(sub, tile_budget // max(1, block_cols * itemsize))
    if rows <= rows_target:
        block_rows = rows
    else:
        block_rows = max(sub, (rows_target // sub) * sub)

    # Megacore (v7x): if everything fits in one block, split the row axis in two
    # so both TensorCores stream HBM concurrently.
    if (_cdiv(rows, block_rows) == 1 and _cdiv(cols, block_cols) == 1
            and rows >= 2 * sub):
        block_rows = sub * _cdiv(_cdiv(rows, 2), sub)

    n_row = _cdiv(rows, block_rows)
    n_col = _cdiv(cols, block_cols)

    # Leading "parallel" axis gets the larger block count (megacore sharding).
    if n_col > n_row:
        grid = (n_col, n_row)
        imap = lambda j, i: (i, j)
    else:
        grid = (n_row, n_col)
        imap = lambda i, j: (i, j)

    tile_bytes = block_rows * block_cols * itemsize
    vmem_limit = int(min(vmem_budget, max(32 << 20, 6 * tile_bytes)))

    # Scalar threshold lives in SMEM -> changing its value never retraces.
    thr = jnp.reshape(jnp.asarray(threshold, dtype=jnp.float32), (1,))

    out = pl.pallas_call(
        _jump_relu_kernel,
        out_shape=jax.ShapeDtypeStruct((rows, cols), x.dtype),
        grid_spec=pltpu.PrefetchScalarGridSpec(
            num_scalar_prefetch=0,
            grid=grid,
            in_specs=[
                pl.BlockSpec(memory_space=pltpu.MemorySpace.SMEM),   # threshold
                pl.BlockSpec((block_rows, block_cols), imap),        # x
            ],
            out_specs=pl.BlockSpec((block_rows, block_cols), imap),
        ),
        compiler_params=pltpu.CompilerParams(
            dimension_semantics=("parallel", "parallel"),
            vmem_limit_bytes=vmem_limit,
        ),
    )(thr, x2)

    return out.reshape(orig_shape) if out.shape != orig_shape else out


def _ref(x, threshold):
    return x * (x.astype(jnp.float32) > jnp.float32(threshold)).astype(x.dtype)


if __name__ == "__main__":
    threshold, bandwidth = 0.25, 1.0  # bandwidth unused in forward
    key = jax.random.PRNGKey(0)
    k1, k2, k3, k4 = jax.random.split(key, 4)

    # Case 1: f32, small tile budget forces a multi-block grid (incl. partial).
    x = jax.random.normal(k1, (48, 512), dtype=jnp.float32)
    out = jax.block_until_ready(
        jump_relu_forward(x, threshold, bandwidth, target_block_bytes=64 * 1024))
    assert out.shape == x.shape and out.dtype == x.dtype
    assert jnp.allclose(out, _ref(x, threshold)), "f32 small-tile mismatch"

    # Case 2: default (large-tile) path, f32 — megacore split of the row axis.
    out2 = jax.block_until_ready(jump_relu_forward(x, threshold, bandwidth))
    assert jnp.allclose(out2, _ref(x, threshold)), "f32 default-tile mismatch"

    # Case 3: bf16, batch not a multiple of the sublane tile, lane-dense cols.
    xb = jax.random.normal(k2, (37, 384), dtype=jnp.bfloat16)
    outb = jax.block_until_ready(jump_relu_forward(xb, threshold, bandwidth))
    assert outb.dtype == xb.dtype and outb.shape == xb.shape
    assert jnp.allclose(outb.astype(jnp.float32),
                        _ref(xb, threshold).astype(jnp.float32)), "bf16 mismatch"

    # Case 4: d_sae not a multiple of 128 -> lane-dense reshape path ((32,96)->(8,384)).
    xc = jax.random.normal(k3, (32, 96), dtype=jnp.float32)
    outc = jax.block_until_ready(jump_relu_forward(xc, threshold, bandwidth))
    assert outc.shape == xc.shape
    assert jnp.allclose(outc, _ref(xc, threshold)), "reshape-path mismatch"

    # Case 5: no lane-dense factoring exists -> masked-store fallback.
    xd = jax.random.normal(k4, (16, 100), dtype=jnp.float32)
    outd = jax.block_until_ready(jump_relu_forward(xd, threshold, bandwidth))
    assert outd.shape == xd.shape
    assert jnp.allclose(outd, _ref(xd, threshold)), "fallback-path mismatch"

    print("KERNEL_OK")
</pallas_src>

<mosaic_0001>
module attributes {stable_mosaic.version = 11 : i64} {
  func.func @_jump_relu_kernel(%arg0: i32, %arg1: i32, %arg2: memref<1xf32, #tpu.memory_space<smem>>, %arg3: memref<32x512xf32, #tpu.memory_space<vmem>>, %arg4: memref<32x512xf32, #tpu.memory_space<vmem>>) attributes {dimension_semantics = [#tpu.dimension_semantics<parallel>, #tpu.dimension_semantics<parallel>], iteration_bounds = array<i64: 2, 1>, scalar_prefetch = 0 : i64, scratch_operands = 0 : i64, tpu.core_type = #tpu.core_type<tc>, window_params = [{transform_indices = @transform_0, window_bounds = array<i64: 1>}, {transform_indices = @transform_1, window_bounds = array<i64: 32, 512>}, {transform_indices = @transform_2, window_bounds = array<i64: 32, 512>}]} {
    %c0 = arith.constant 0 : index
    %c0_0 = arith.constant 0 : index
    %0 = vector.load %arg3[%c0, %c0_0] : memref<32x512xf32, #tpu.memory_space<vmem>>, vector<32x512xf32>
    %c0_1 = arith.constant 0 : index
    %1 = memref.load %arg2[%c0_1] : memref<1xf32, #tpu.memory_space<smem>>
    %2 = vector.broadcast %1 : f32 to vector<32x512xf32>
    %3 = arith.cmpf ogt, %0, %2 : vector<32x512xf32>
    %4 = arith.extui %3 : vector<32x512xi1> to vector<32x512xi32>
    %5 = arith.sitofp %4 : vector<32x512xi32> to vector<32x512xf32>
    %6 = arith.mulf %0, %5 : vector<32x512xf32>
    %c0_2 = arith.constant 0 : index
    %c0_3 = arith.constant 0 : index
    %7 = vector.load %arg4[%c0_2, %c0_3] : memref<32x512xf32, #tpu.memory_space<vmem>>, vector<32x512xf32>
    tpu.vector_store %arg4[%c0_2, %c0_3], %6 {strides = array<i32>} : memref<32x512xf32, #tpu.memory_space<vmem>>, vector<32x512xf32>,
    return
  }
  func.func @transform_0(%arg0: i32, %arg1: i32) -> i32 {
    %c0_i32 = arith.constant 0 : i32
    %c0_i32_0 = arith.constant 0 : i32
    return %c0_i32 : i32
  }
  func.func @transform_1(%arg0: i32, %arg1: i32) -> (i32, i32) {
    %c0_i32 = arith.constant 0 : i32
    return %arg0, %arg1 : i32, i32
  }
  func.func @transform_2(%arg0: i32, %arg1: i32) -> (i32, i32) {
    %c0_i32 = arith.constant 0 : i32
    return %arg0, %arg1 : i32, i32
  }
}

</mosaic_0001>

<bundles_post_ra>
// kernel: tpu_custom_call.1
= control target key start
LH: loop header
LB: loop body
LE: loop exit
PB: predicated region body
PF: predicated region fallthrough
CT: control target
= control target key end

     0   :  { %s914_s0 = inlined_call_operand.<no memory space> [shape: f32[1], index: 0, kind: input, shape index: {}]   ;;  %s915_s1 = inlined_call_operand.hbm [shape: f32[48,512], index: 1, kind: input, shape index: {}]   ;;  %s916_s2 = inlined_call_operand.hbm [shape: f32[48,512], index: 2, kind: output, shape index: {}]  }
   0x1   :  { %7 = sst [smem:[#allocation2]] %s914_s0 }
   0x2   :  { %8 = vsyncpa [#allocation4], 0 }
   0x3   :  { %10 = vsyncpa [#allocation4 + $0x1], 0 }
   0x4   :  { %11 = vsyncpa [#allocation5], 0 }
   0x5   :  { %13 = vsyncpa [#allocation5 + $0x1], 0  ;;  %s658_s11 = smov 0   ;;  %s660_s12 = smov 0  }
   0x6   :  { %s662_s13 = smov 0   ;;  %s664_s14 = smov 0  }
   0x7   :  { %s666_s15 = smov 0   ;;  %s668_s16 = smov 0  }
   0x8 LB: > { %s412_s0 = sadd.s32 4294967295, %s631_s16   ;;  %s413_s17 = sadd.s32 4294967294, %s631_s16   ;;  %s631_s16 = sphi %s668_s16, %s19_s16   ;;  %s627_s15 = sphi %s666_s15, %s927_s15   ;;  %s623_s14 = sphi %s664_s14, %s926_s14   ;;  %s619_s13 = sphi %s662_s13, %s925_s13   ;;  %s615_s12 = sphi %s660_s12, %s924_s12   ;;  %s611_s11 = sphi %s658_s11, %s923_s11  }
   0x9   : > { %s31_s18 = sadd.s32 1, %s627_s15  ;;  %s61_s19 = sadd.s32 1, %s619_s13 }
   0xa   : > { %p33_p0 = scmp.ge.s32.totalorder %s31_s18, 2  ;;  %p68_p1 = scmp.ne.s32.totalorder %s619_s13, %s615_s12 }
   0xb   : > { %p69_p2 = scmp.eq.s32.totalorder %s631_s16, 0  ;;  %p74_p3 = scmp.ne.s32.totalorder %s615_s12, %s611_s11 }
   0xc   : > { %s929_s18 = smov (%p33_p0, %s31_s18), 0  ;;  %p75_p5 = scmp.eq.s32.totalorder %s412_s0, 0 }
   0xd   : > { %p70_p4 = por %p69_p2, %p68_p1  ;;  %s56_s20 = ssub.s32 %s627_s15, %s929_s18 }
   0xe   : > { %p100_p6 = scmp.eq.s32.totalorder %s412_s0, 1  ;;  %p59_p7 = scmp.eq.s32.totalorder %s56_s20, 0 }
   0xf   : > { %p701_p8 = por %p75_p5, %p74_p3  ;;  %p106_p10 = scmp.eq.s32.totalorder %s413_s17, 1 }
  0x10   : > { %p705_p9 = por %p100_p6, %p68_p1  ;;  %p917_p12 = scmp.ge.s32.totalorder %s631_s16, 2 }
  0x11   : > { %s710_s23 = scalar_select %p59_p7, %s619_s13, %s61_s19  }
  0x12   : > { %p712_p11 = por %p106_p10, %p74_p3  ;;  %125 = sbr.rel (%p917_p12) target bundleno = 60 (0x3c), region = 20 }
  0x14   : > { %s920_s24 = scalar_select %p712_p11, 1, 0 }
  0x19   : > { %128 = sbr.rel (!%p70_p4) target bundleno = 60 (0x3c), region = 24  ;;  %s129_s25 = sand.u32 (%p70_p4), 1, %s619_s13  }
  0x1a   : > { %s417_s26 = sshll.u32 (%p70_p4), %s627_s15, 2  ;;  %s416_s27 = sshll.u32 (%p70_p4), %s129_s25, 7 }
  0x1b   : > { %s136_s28 = ssub.s32 (%p70_p4), 6, %s417_s26  ;;  %s724_s3 = scalar_lea.sflag (%p70_p4), [#allocation4], %s129_s25 }
  0x1c   : > { %p137_p13 = scmp.lt.s32.totalorder (%p70_p4), %s136_s28, 4  ;;  %s133_s4 = scalar_lea.vmem (%p70_p4), [#allocation3], %s416_s27 }
  0x20   : > { %s931_s28 = smov (!%p137_p13, %s136_s28), 4 }
  0x21   : > { %s721_s29 = sshll.u32 %s931_s28, 9 }
  0x22   : > { %s142_s30 = ssub.s32 2048, %s721_s29 }
  0x23   : > { %143 = vsyncadd %s724_s3, %s142_s30  ;;  %p420_p0 = scmp.ne.s32.totalorder %s721_s29, 0  ;;  %s457_s5 = sshll.u32 %s627_s15, 11 }
  0x24   : > { %s732_s8 = scalar_lea.hbm %s915_s1, %s457_s5  ;;  %s150_s9 = sshll.u32 %s133_s4, 4  ;;  %s734_s9 = int_to_ptr.vmem [resolvable:$true] %s150_s9 }
  0x25   : > { %s521_s10 = scalar_lea.hbm %s732_s8, %s721_s29  ;;  %s525_s19 = scalar_lea.hbm %s915_s1, 3072 }
  0x26   : > { %p522_p1 = scmp.ne.s32.totalorder %s732_s8, %s521_s10  ;;  %p526_p4 = scmp.lt.u32.totalorder %s732_s8, %s915_s1 }
  0x27   : > { %p527_p5 = scmp.lt.u32.totalorder %s525_s19, %s521_s10  ;;  %p529_p7 = scmp.lt.u32.totalorder %s521_s10, %s732_s8 }
  0x28   : > { %p523_p2 = pnand %p522_p1, %p420_p0 }
  0x29   : > { %p528_p6 = por %p527_p5, %p526_p4 }
  0x2a   : > { %p524_p3 = pneg %p523_p2 }
  0x2b   : > { %p530_p10 = por %p529_p7, %p528_p6 }
  0x2d   : > { %p531_p13 = pnand %p530_p10, %p524_p3 }
  0x2f   : > { %534 = shalt.err (!%p531_p13)
}
  0x30   : > { %s535_s26 = scalar_lea.vmem %s734_s9, %s721_s29  ;;  %s633_s27 = smov [#allocation3]  }
  0x31   : > { %p536_p1 = scmp.ne.s32.totalorder %s734_s9, %s535_s26  ;;  %s539_s28 = sshll.u32 %s633_s27, 4  ;;  %s540_s28 = int_to_ptr.vmem [resolvable:$false] %s539_s28 }
  0x32   : > { %s541_s30 = scalar_lea.vmem %s540_s28, 4096  ;;  %p542_p11 = scmp.lt.s32.totalorder %s734_s9, %s540_s28 }
  0x33   : > { %p537_p2 = pnand %p536_p1, %p420_p0  ;;  %p543_p4 = scmp.lt.s32.totalorder %s541_s30, %s535_s26 }
  0x35   : > { %p538_p12 = pneg %p537_p2  ;;  %p544_p5 = por %p543_p4, %p542_p11 }
  0x37   : > { %p545_p6 = pnand %p544_p5, %p538_p12 }
  0x39   : > { %548 = shalt.err (!%p545_p6)
}
  0x3a   : > { %s634_s4 = smov 512   ;;  %s635_s5 = smov 32  }
  0x3b   : > { %156 = dma.hbm_to_vmem [thread:$0]  (%p420_p0), %s732_s8, %s721_s29, %s734_s9, %s724_s3, %s634_s4, %s634_s4, %s635_s5  }
  0x3c PF: > { %p425_p3 = scmp.ge.s32.totalorder %s631_s16, 1  ;;  %p158_p7 = scmp.lt.s32.totalorder %s631_s16, 3 }
  0x3e   : > { %p159_p10 = pnand %p425_p3, %p158_p7 }
  0x3f   : > { %s764_s6 = sand.u32 (!%p159_p10), 1, %s615_s12  }
  0x40   : > { %162 = sbr.rel (%p159_p10) target bundleno = 122 (0x7a), region = 28  ;;  %s426_s7 = sshll.u32 (!%p159_p10), %s764_s6, 7 }
  0x41   : > { %s165_s10 = scalar_lea.sflag (!%p159_p10), [#allocation4], %s764_s6  ;;  %s770_s0 = scalar_lea.vmem (!%p159_p10), [#allocation3], %s426_s7 }
  0x47   : > { %602 = dma.done.wait (%p701_p8), %s165_s10, 2048  }
  0x48   : > { %604 = vsyncadd (%p701_p8), %s165_s10, 4294965248  ;;  %s219_s29 = sld [smem:[#allocation2]]  ;;  %v203_v0 = vld [vmem:[%s770_s0] sm:$0xff]  ;;  %v204_v2 = vld [vmem:[%s770_s0 + $0x8] sm:$0xff]  ;;  %v636_v7 = vmov 0.0   ;;  %s802_s21 = scalar_lea.vmem [#allocation6], %s426_s7 }
  0x49   : > { %v205_v3 = vld [vmem:[%s770_s0 + $0x10] sm:$0xff]  ;;  %v206_v4 = vld [vmem:[%s770_s0 + $0x18] sm:$0xff]  ;;  %v207_v5 = vld [vmem:[%s770_s0 + $0x20] sm:$0xff]  ;;  %s302_s3 = scalar_lea.sflag [#allocation5], %s764_s6  ;;  %s445_s8 = sshll.u32 (%p705_p9), %s623_s14, 2 }
  0x4a   : > { %v208_v6 = vld [vmem:[%s770_s0 + $0x28] sm:$0xff]  ;;  %v209_v11 = vld [vmem:[%s770_s0 + $0x30] sm:$0xff]  ;;  %v210_v12 = vld [vmem:[%s770_s0 + $0x38] sm:$0xff]  ;;  %s311_s9 = ssub.s32 (%p705_p9), 6, %s445_s8 }
  0x4b   : > { %v211_v18 = vld [vmem:[%s770_s0 + $0x40] sm:$0xff]  ;;  %v212_v19 = vld [vmem:[%s770_s0 + $0x48] sm:$0xff]  ;;  %v213_v20 = vld [vmem:[%s770_s0 + $0x50] sm:$0xff]  ;;  %p312_p8 = scmp.lt.s32.totalorder (%p705_p9), %s311_s9, 4 }
  0x4c   : > { %v214_v24 = vld [vmem:[%s770_s0 + $0x58] sm:$0xff]  ;;  %v215_v30 = vld [vmem:[%s770_s0 + $0x60] sm:$0xff]  ;;  %v216_v31 = vld [vmem:[%s770_s0 + $0x68] sm:$0xff] }
  0x4d   : > { %v217_v32 = vld [vmem:[%s770_s0 + $0x70] sm:$0xff]  ;;  %v218_v36 = vld [vmem:[%s770_s0 + $0x78] sm:$0xff] }
  0x4e   : > { %v777_v1 = vstv %s219_s29 }
  0x4f   : > { %vm221_vm0 = vcmp.gt.f32.partialorder %v203_v0, %v777_v1  ;;  %vm222_vm1 = vcmp.gt.f32.partialorder %v204_v2, %v777_v1  ;;  %vm223_vm2 = vcmp.gt.f32.partialorder %v205_v3, %v777_v1  ;;  %vm224_vm3 = vcmp.gt.f32.partialorder %v206_v4, %v777_v1 }
  0x50   : > { %v428_v8 = vsel %vm221_vm0, 1.0, %v636_v7  ;;  %v429_v9 = vsel %vm222_vm1, 1.0, %v636_v7  ;;  %v430_v10 = vsel %vm223_vm2, 1.0, %v636_v7  ;;  %v431_v16 = vsel %vm224_vm3, 1.0, %v636_v7 }
  0x51   : > { %v269_v13 = vmul.f32 %v428_v8, %v203_v0  ;;  %v270_v14 = vmul.f32 %v429_v9, %v204_v2  ;;  %v271_v15 = vmul.f32 %v430_v10, %v205_v3  ;;  %v272_v17 = vmul.f32 %v431_v16, %v206_v4 }
  0x52   : > { %vm225_vm4 = vcmp.gt.f32.partialorder %v207_v5, %v777_v1  ;;  %vm226_vm5 = vcmp.gt.f32.partialorder %v208_v6, %v777_v1  ;;  %vm227_vm6 = vcmp.gt.f32.partialorder %v209_v11, %v777_v1  ;;  %vm228_vm7 = vcmp.gt.f32.partialorder %v210_v12, %v777_v1 }
  0x53   : > { %285 = vst [vmem:[%s802_s21] sm:$0xff] %v269_v13  ;;  %286 = vst [vmem:[%s802_s21 + $0x8] sm:$0xff] %v270_v14  ;;  %v432_v21 = vsel %vm225_vm4, 1.0, %v636_v7  ;;  %v433_v22 = vsel %vm226_vm5, 1.0, %v636_v7  ;;  %v434_v23 = vsel %vm227_vm6, 1.0, %v636_v7  ;;  %v435_v28 = vsel %vm228_vm7, 1.0, %v636_v7 }
  0x54   : > { %287 = vst [vmem:[%s802_s21 + $0x10] sm:$0xff] %v271_v15  ;;  %288 = vst [vmem:[%s802_s21 + $0x18] sm:$0xff] %v272_v17  ;;  %v273_v25 = vmul.f32 %v432_v21, %v207_v5  ;;  %v274_v26 = vmul.f32 %v433_v22, %v208_v6  ;;  %v275_v27 = vmul.f32 %v434_v23, %v209_v11 }
  0x55   : > { %v276_v29 = vmul.f32 %v435_v28, %v210_v12  ;;  %vm229_vm8 = vcmp.gt.f32.partialorder %v211_v18, %v777_v1  ;;  %vm230_vm9 = vcmp.gt.f32.partialorder %v212_v19, %v777_v1  ;;  %vm231_vm10 = vcmp.gt.f32.partialorder %v213_v20, %v777_v1 }
  0x56   : > { %289 = vst [vmem:[%s802_s21 + $0x20] sm:$0xff] %v273_v25  ;;  %290 = vst [vmem:[%s802_s21 + $0x28] sm:$0xff] %v274_v26  ;;  %v436_v33 = vsel %vm229_vm8, 1.0, %v636_v7  ;;  %v437_v34 = vsel %vm230_vm9, 1.0, %v636_v7  ;;  %v438_v35 = vsel %vm231_vm10, 1.0, %v636_v7  ;;  %vm232_vm11 = vcmp.gt.f32.partialorder %v214_v24, %v777_v1 }
  0x57   : > { %291 = vst [vmem:[%s802_s21 + $0x30] sm:$0xff] %v275_v27  ;;  %292 = vst [vmem:[%s802_s21 + $0x38] sm:$0xff] %v276_v29  ;;  %v277_v37 = vmul.f32 %v436_v33, %v211_v18  ;;  %v278_v38 = vmul.f32 %v437_v34, %v212_v19  ;;  %v279_v39 = vmul.f32 %v438_v35, %v213_v20  ;;  %v439_v40 = vsel %vm232_vm11, 1.0, %v636_v7  ;;  %308 = sbr.rel (!%p705_p9) target bundleno = 122 (0x7a), region = 36 }
  0x58   : > { %v280_v41 = vmul.f32 %v439_v40, %v214_v24  ;;  %vm233_vm12 = vcmp.gt.f32.partialorder %v215_v30, %v777_v1  ;;  %vm234_vm13 = vcmp.gt.f32.partialorder %v216_v31, %v777_v1  ;;  %vm235_vm14 = vcmp.gt.f32.partialorder %v217_v32, %v777_v1 }
  0x59   : > { %293 = vst [vmem:[%s802_s21 + $0x40] sm:$0xff] %v277_v37  ;;  %294 = vst [vmem:[%s802_s21 + $0x48] sm:$0xff] %v278_v38  ;;  %v440_v42 = vsel %vm233_vm12, 1.0, %v636_v7  ;;  %v441_v43 = vsel %vm234_vm13, 1.0, %v636_v7  ;;  %v442_v44 = vsel %vm235_vm14, 1.0, %v636_v7  ;;  %vm236_vm15 = vcmp.gt.f32.partialorder %v218_v36, %v777_v1 }
  0x5a   : > { %295 = vst [vmem:[%s802_s21 + $0x50] sm:$0xff] %v279_v39  ;;  %296 = vst [vmem:[%s802_s21 + $0x58] sm:$0xff] %v280_v41  ;;  %v281_v45 = vmul.f32 %v440_v42, %v215_v30  ;;  %v282_v46 = vmul.f32 %v441_v43, %v216_v31  ;;  %v283_v47 = vmul.f32 %v442_v44, %v217_v32  ;;  %v443_v48 = vsel %vm236_vm15, 1.0, %v636_v7 }
  0x5b   : > { %v284_v49 = vmul.f32 %v443_v48, %v218_v36 }
  0x5c   : > { %297 = vst [vmem:[%s802_s21 + $0x60] sm:$0xff] %v281_v45  ;;  %298 = vst [vmem:[%s802_s21 + $0x68] sm:$0xff] %v282_v46 }
  0x5d   : > { %299 = vst [vmem:[%s802_s21 + $0x70] sm:$0xff] %v283_v47  ;;  %300 = vst [vmem:[%s802_s21 + $0x78] sm:$0xff] %v284_v49 }
  0x5e   : > { %s933_s9 = smov (!%p312_p8, %s311_s9), 4 }
  0x5f   : > { %s850_s17 = sshll.u32 %s933_s9, 9 }
  0x60   : > { %s317_s19 = ssub.s32 2048, %s850_s17 }
  0x61   : > { %318 = vsyncadd %s302_s3, %s317_s19  ;;  %p448_p11 = scmp.ne.s32.totalorder %s850_s17, 0  ;;  %s460_s22 = sshll.u32 %s623_s14, 11 }
  0x62   : > { %s860_s26 = scalar_lea.hbm %s916_s2, %s460_s22  ;;  %s325_s27 = sshll.u32 %s802_s21, 4  ;;  %s863_s27 = int_to_ptr.vmem [resolvable:$true] %s325_s27 }
  0x63   : > { %s549_s28 = scalar_lea.vmem %s863_s27, %s850_s17  ;;  %s637_s30 = smov [#allocation6]  }
  0x64   : > { %p550_p9 = scmp.ne.s32.totalorder %s863_s27, %s549_s28  ;;  %s553_s4 = sshll.u32 %s637_s30, 4  ;;  %s554_s4 = int_to_ptr.vmem [resolvable:$false] %s553_s4 }
  0x65   : > { %s555_s14 = scalar_lea.vmem %s554_s4, 4096  ;;  %p556_p13 = scmp.lt.s32.totalorder %s863_s27, %s554_s4 }
  0x66   : > { %p551_p12 = pnand %p550_p9, %p448_p11  ;;  %p557_p1 = scmp.lt.s32.totalorder %s555_s14, %s549_s28 }
  0x68   : > { %p552_p0 = pneg %p551_p12  ;;  %p558_p2 = por %p557_p1, %p556_p13 }
  0x6a   : > { %p559_p4 = pnand %p558_p2, %p552_p0 }
  0x6c   : > { %562 = shalt.err (!%p559_p4)
}
  0x6d   : > { %s563_s5 = scalar_lea.hbm %s860_s26, %s850_s17  ;;  %s567_s0 = scalar_lea.hbm %s916_s2, 3072 }
  0x6e   : > { %p564_p5 = scmp.ne.s32.totalorder %s860_s26, %s563_s5  ;;  %p568_p7 = scmp.lt.u32.totalorder %s860_s26, %s916_s2 }
  0x6f   : > { %p569_p10 = scmp.lt.u32.totalorder %s567_s0, %s563_s5  ;;  %p571_p9 = scmp.lt.u32.totalorder %s563_s5, %s860_s26 }
  0x70   : > { %p565_p6 = pnand %p564_p5, %p448_p11 }
  0x71   : > { %p570_p8 = por %p569_p10, %p568_p7 }
  0x72   : > { %p566_p3 = pneg %p565_p6 }
  0x73   : > { %p572_p12 = por %p571_p9, %p570_p8 }
  0x75   : > { %p573_p0 = pnand %p572_p12, %p566_p3 }
  0x77   : > { %576 = shalt.err (!%p573_p0)
}
  0x78   : > { %s638_s8 = smov 512   ;;  %s639_s9 = smov 32  }
  0x79   : > { %331 = dma.vmem_to_hbm [thread:$0]  (%p448_p11), %s863_s27, %s850_s17, %s860_s26, %s302_s3, %s638_s8, %s638_s8, %s639_s9  }
  0x7a PF: > { %s340_s19 = sand.u32 1, %s611_s11   ;;  %p921_p13 = scmp.ne.s32.totalorder %s920_s24, 0 }
  0x7b   : > { %p922_p1 = scmp.ge.s32.totalorder %s631_s16, 2  ;;  %s341_s22 = scalar_lea.sflag [#allocation5], %s340_s19 }
  0x7d   : > { %p464_p2 = pnand %p922_p1, %p921_p13 }
  0x7f   : > { %606 = dma.done.wait (!%p464_p2), %s341_s22, 2048  }
  0x80   : > { %608 = vsyncadd (!%p464_p2), %s341_s22, 4294965248  ;;  %s19_s16 = sadd.s32 1, %s631_s16   ;;  %s923_s11 = smov %s615_s12 }
  0x81   : > { %p16_p4 = scmp.ge.s32.totalorder %s19_s16, 4   ;;  %s924_s12 = smov %s619_s13 }
  0x82   : > { %s925_s13 = smov %s710_s23  ;;  %s926_s14 = smov %s627_s15 }
  0x83   : > { %s927_s15 = smov %s929_s18  ;;  %18 = sbr.rel (!%p16_p4) target bundleno = 8 (0x8), region = 73 }
  0x8a   :  { %346 = vsyncpa [#allocation4], 1 }
  0x8b   :  { %348 = vsyncpa [#allocation4 + $0x1], 1 }
  0x8c   :  { %349 = vsyncpa [#allocation5], 1 }
  0x8d   :  { %351 = vsyncpa [#allocation5 + $0x1], 1 }

</bundles_post_ra>
